<compile_context>
chip_gen: v6e
topology: v6e:2x2x1
jax: 0.10.0
libtpu: 0.0.40
codegen_flags: <defaults>
</compile_context>

<pallas_src>
import functools

import jax
import jax.numpy as jnp
from jax.experimental import pallas as pl
from jax.experimental.pallas import tpu as pltpu


def _round_up(x, m):
    return ((x + m - 1) // m) * m


def rnn_seq_kernel(x_ref, wx_ref, whh_ref, who_ref, bias_ref, o_ref, hprev_ref,
                   *, T, B, Dh_p, Do_p):
    """Single-invocation kernel: full sequence recurrence.

    x_ref:     (T*B, D_in)       time-major flattened embedded input
    wx_ref:    (D_in, Dh_p+Do_p) [W_ih_x | W_io_x] (input -> hidden/out), zero padded
    whh_ref:   (Dh_p, Dh_p)      hidden -> hidden, zero padded
    who_ref:   (Dh_p, Do_p)      hidden -> output, zero padded
    bias_ref:  (1, Dh_p+Do_p)    [b_ih | b_io], -inf in padded logit lanes
    o_ref:     (B, T, Do_p)      log_softmax outputs (padded lanes = -inf)
    hprev_ref: (T*B, Dh_p)       VMEM scratch: pre-update hidden state per timestep
    """
    # ---- 1. all x-dependent work for every timestep: ONE MXU matmul (no seq. dep) ----
    xproj = jnp.dot(x_ref[...], wx_ref[...], preferred_element_type=jnp.float32)
    xproj = xproj + bias_ref[...]                    # (T*B, Dh_p + Do_p)
    xh = xproj[:, :Dh_p]                             # lane-tile-aligned slices (free)
    xo = xproj[:, Dh_p:]

    whh = whh_ref[...]                               # keep resident across the loop

    # ---- 2. serial recurrence: only the narrow hidden->hidden matmul per step ----
    # T is small and static: fully unrolled Python loop -> static slice offsets,
    # LLO scheduler can overlap consecutive steps' non-dependent work.
    h = jnp.zeros((B, Dh_p), jnp.float32)
    hprev_ref[0:B, :] = h                            # hidden before step 0
    for t in range(1, T):
        # hidden after step t-1  ==  hidden before step t  (matches PyTorch ordering:
        # output at step t uses the PRE-update hidden).
        h = xh[(t - 1) * B:t * B, :] + jnp.dot(
            h, whh, preferred_element_type=jnp.float32)
        hprev_ref[t * B:(t + 1) * B, :] = h

    # ---- 3. batched output projection + single log_softmax over all timesteps ----
    logits = xo + jnp.dot(hprev_ref[...], who_ref[...],
                          preferred_element_type=jnp.float32)   # (T*B, Do_p)
    m = jnp.max(logits, axis=-1, keepdims=True)
    lse = m + jnp.log(jnp.sum(jnp.exp(logits - m), axis=-1, keepdims=True))
    logp = logits - lse                              # padded lanes stay -inf

    # ---- 4. store directly in (B, T, Do_p) layout; lane dim (128) is dense ----
    for t in range(T):
        o_ref[:, t:t + 1, :] = logp[t * B:(t + 1) * B, :][:, None, :]


def rnn_forward(tokens, emb, w_ih, b_ih, w_io, b_io):
    """tokens: (B, T) int32; emb: (V, D_in);
    w_ih: (D_h, D_in+D_h), b_ih: (D_h,); w_io: (D_out, D_in+D_h), b_io: (D_out,)
    (PyTorch nn.Linear convention: y = x @ W.T + b). Returns (B, T, D_out) log-probs."""
    B, T = tokens.shape
    V, D_in = emb.shape
    D_h = w_ih.shape[0]
    D_out = w_io.shape[0]

    Dh_p = _round_up(D_h, 128)       # pad hidden width to a lane tile
    Do_p = _round_up(D_out, 128)     # pad output width to a lane tile (lane-dense store)
    Dz = Dh_p + Do_p

    # Embedding gather directly in time-major flattened order: row t*B + b = token (b, t).
    # TODO(synk): embedding gather is plain-JAX glue (data-dependent row gather).
    x_flat = jnp.take(emb, tokens.T.reshape(-1), axis=0).astype(jnp.float32)  # (T*B, D_in)

    # Repack the two concatenated-input Linear layers into fused/padded weights so the
    # kernel computes  xproj = x @ Wx + bias,  h_t = xh_t + h @ Whh,  logits = xo + h @ Who.
    wx = jnp.zeros((D_in, Dz), jnp.float32)
    wx = wx.at[:, :D_h].set(w_ih[:, :D_in].T)                 # input -> hidden
    wx = wx.at[:, Dh_p:Dh_p + D_out].set(w_io[:, :D_in].T)    # input -> output

    whh = jnp.zeros((Dh_p, Dh_p), jnp.float32)
    whh = whh.at[:D_h, :D_h].set(w_ih[:, D_in:].T)            # hidden -> hidden

    who = jnp.zeros((Dh_p, Do_p), jnp.float32)
    who = who.at[:D_h, :D_out].set(w_io[:, D_in:].T)          # hidden -> output

    bias = jnp.zeros((1, Dz), jnp.float32)
    bias = bias.at[0, Dh_p:].set(-jnp.inf)                    # padded logit lanes -> -inf
    bias = bias.at[0, :D_h].set(b_ih)
    bias = bias.at[0, Dh_p:Dh_p + D_out].set(b_io)

    kernel = functools.partial(rnn_seq_kernel, T=T, B=B, Dh_p=Dh_p, Do_p=Do_p)

    out_padded = pl.pallas_call(
        kernel,
        out_shape=jax.ShapeDtypeStruct((B, T, Do_p), jnp.float32),
        grid_spec=pltpu.PrefetchScalarGridSpec(
            num_scalar_prefetch=0,
            grid=(1,),
            in_specs=[
                pl.BlockSpec((T * B, D_in), lambda i: (0, 0)),   # x (time-major, flat)
                pl.BlockSpec((D_in, Dz), lambda i: (0, 0)),      # fused input weights
                pl.BlockSpec((Dh_p, Dh_p), lambda i: (0, 0)),    # hidden -> hidden
                pl.BlockSpec((Dh_p, Do_p), lambda i: (0, 0)),    # hidden -> output
                pl.BlockSpec((1, Dz), lambda i: (0, 0)),         # fused bias
            ],
            out_specs=pl.BlockSpec((B, T, Do_p), lambda i: (0, 0, 0)),
            scratch_shapes=[pltpu.VMEM((T * B, Dh_p), jnp.float32)],
        ),
        compiler_params=pltpu.CompilerParams(
            dimension_semantics=("arbitrary",)),
    )(x_flat, wx, whh, who, bias)

    # Drop the padded logit lanes; already in (B, T, D_out) layout — no transpose.
    return out_padded[:, :, :D_out]


def rnn_forward_ref(tokens, emb, w_ih, b_ih, w_io, b_io):
    """Pure-JAX reference mirroring the PyTorch forward."""
    B, T = tokens.shape
    D_h = w_ih.shape[0]
    embedded = jnp.take(emb, tokens, axis=0)               # (B, T, D_in)

    def step(h, x_t):
        combined = jnp.concatenate([x_t, h], axis=1)
        new_h = combined @ w_ih.T + b_ih
        out = combined @ w_io.T + b_io
        return new_h, out

    h0 = jnp.zeros((B, D_h), jnp.float32)
    _, outs = jax.lax.scan(step, h0, jnp.transpose(embedded, (1, 0, 2)))
    outs = jnp.transpose(outs, (1, 0, 2))                  # (B, T, D_out)
    return jax.nn.log_softmax(outs, axis=-1)


if __name__ == "__main__":
    # Small shapes consistent with the module's forward.
    vocab_size, dim_input, dim_hidden, dim_output = 50, 32, 32, 16
    B, T = 2, 8

    key = jax.random.PRNGKey(0)
    k_emb, k_wih, k_bih, k_wio, k_bio, k_tok = jax.random.split(key, 6)

    emb = jax.random.normal(k_emb, (vocab_size, dim_input), jnp.float32) * 0.1
    w_ih = jax.random.normal(k_wih, (dim_hidden, dim_input + dim_hidden),
                             jnp.float32) * 0.1
    b_ih = jax.random.normal(k_bih, (dim_hidden,), jnp.float32) * 0.1
    w_io = jax.random.normal(k_wio, (dim_output, dim_input + dim_hidden),
                             jnp.float32) * 0.1
    b_io = jax.random.normal(k_bio, (dim_output,), jnp.float32) * 0.1

    tokens = jax.random.randint(k_tok, (B, T), 0, vocab_size, jnp.int32)

    out = rnn_forward(tokens, emb, w_ih, b_ih, w_io, b_io)
    out = jax.block_until_ready(out)

    ref = rnn_forward_ref(tokens, emb, w_ih, b_ih, w_io, b_io)
    assert out.shape == (B, T, dim_output)
    assert jnp.allclose(out, ref, atol=1e-5, rtol=1e-5), "mismatch vs JAX reference"

    print("KERNEL_OK")
</pallas_src>

<mosaic_0001>
module attributes {stable_mosaic.version = 11 : i64} {
  func.func @rnn_seq_kernel(%arg0: i32, %arg1: memref<16x32xf32, #tpu.memory_space<vmem>>, %arg2: memref<32x256xf32, #tpu.memory_space<vmem>>, %arg3: memref<128x128xf32, #tpu.memory_space<vmem>>, %arg4: memref<128x128xf32, #tpu.memory_space<vmem>>, %arg5: memref<1x256xf32, #tpu.memory_space<vmem>>, %arg6: memref<2x8x128xf32, #tpu.memory_space<vmem>>, %arg7: memref<16x128xf32, #tpu.memory_space<vmem>>) attributes {dimension_semantics = [#tpu.dimension_semantics<arbitrary>], iteration_bounds = array<i64: 1>, scalar_prefetch = 0 : i64, scratch_operands = 1 : i64, tpu.core_type = #tpu.core_type<tc>, window_params = [{pipeline_mode = #tpu.pipeline_mode<synchronous>, transform_indices = @transform_0, window_bounds = array<i64: 16, 32>}, {pipeline_mode = #tpu.pipeline_mode<synchronous>, transform_indices = @transform_1, window_bounds = array<i64: 32, 256>}, {pipeline_mode = #tpu.pipeline_mode<synchronous>, transform_indices = @transform_2, window_bounds = array<i64: 128, 128>}, {pipeline_mode = #tpu.pipeline_mode<synchronous>, transform_indices = @transform_3, window_bounds = array<i64: 128, 128>}, {pipeline_mode = #tpu.pipeline_mode<synchronous>, transform_indices = @transform_4, window_bounds = array<i64: 1, 256>}, {pipeline_mode = #tpu.pipeline_mode<synchronous>, transform_indices = @transform_5, window_bounds = array<i64: 2, 8, 128>}]} {
    %c0 = arith.constant 0 : index
    %c0_0 = arith.constant 0 : index
    %0 = vector.load %arg1[%c0, %c0_0] : memref<16x32xf32, #tpu.memory_space<vmem>>, vector<16x32xf32>
    %c0_1 = arith.constant 0 : index
    %c0_2 = arith.constant 0 : index
    %1 = vector.load %arg2[%c0_1, %c0_2] : memref<32x256xf32, #tpu.memory_space<vmem>>, vector<32x256xf32>
    %cst = arith.constant dense<0.000000e+00> : vector<16x256xf32>
    %2 = tpu.matmul %0, %1, %cst {dimension_numbers = #tpu.dot_dimension_numbers<[1], [0], [0], [1], [0, 0, 1, 1], [], []>} : vector<16x32xf32>, vector<32x256xf32>, vector<16x256xf32> -> vector<16x256xf32>
    %c0_3 = arith.constant 0 : index
    %c0_4 = arith.constant 0 : index
    %3 = vector.load %arg5[%c0_3, %c0_4] : memref<1x256xf32, #tpu.memory_space<vmem>>, vector<1x256xf32>
    %4 = vector.broadcast %3 : vector<1x256xf32> to vector<16x256xf32>
    %5 = arith.addf %2, %4 : vector<16x256xf32>
    %6 = vector.extract_strided_slice %5 {offsets = [0, 0], sizes = [16, 128], strides = [1, 1]} : vector<16x256xf32> to vector<16x128xf32>
    %7 = vector.extract_strided_slice %5 {offsets = [0, 128], sizes = [16, 128], strides = [1, 1]} : vector<16x256xf32> to vector<16x128xf32>
    %c0_5 = arith.constant 0 : index
    %c0_6 = arith.constant 0 : index
    %8 = vector.load %arg3[%c0_5, %c0_6] : memref<128x128xf32, #tpu.memory_space<vmem>>, vector<128x128xf32>
    %cst_7 = arith.constant 0.000000e+00 : f32
    %9 = vector.broadcast %cst_7 : f32 to vector<2x128xf32>
    %c0_8 = arith.constant 0 : index
    %c0_9 = arith.constant 0 : index
    %10 = vector.load %arg7[%c0_8, %c0_9] : memref<16x128xf32, #tpu.memory_space<vmem>>, vector<2x128xf32>
    tpu.vector_store %arg7[%c0_8, %c0_9], %9 {strides = array<i32>} : memref<16x128xf32, #tpu.memory_space<vmem>>, vector<2x128xf32>,
    %11 = vector.extract_strided_slice %6 {offsets = [0, 0], sizes = [2, 128], strides = [1, 1]} : vector<16x128xf32> to vector<2x128xf32>
    %cst_10 = arith.constant dense<0.000000e+00> : vector<2x128xf32>
    %12 = tpu.matmul %9, %8, %cst_10 {dimension_numbers = #tpu.dot_dimension_numbers<[1], [0], [0], [1], [0, 0, 1, 1], [], []>} : vector<2x128xf32>, vector<128x128xf32>, vector<2x128xf32> -> vector<2x128xf32>
    %13 = arith.addf %11, %12 : vector<2x128xf32>
    %c2 = arith.constant 2 : index
    %c0_11 = arith.constant 0 : index
    %14 = vector.load %arg7[%c2, %c0_11] : memref<16x128xf32, #tpu.memory_space<vmem>>, vector<2x128xf32>
    tpu.vector_store %arg7[%c2, %c0_11], %13 {strides = array<i32>} : memref<16x128xf32, #tpu.memory_space<vmem>>, vector<2x128xf32>,
    %15 = vector.extract_strided_slice %6 {offsets = [2, 0], sizes = [2, 128], strides = [1, 1]} : vector<16x128xf32> to vector<2x128xf32>
    %cst_12 = arith.constant dense<0.000000e+00> : vector<2x128xf32>
    %16 = tpu.matmul %13, %8, %cst_12 {dimension_numbers = #tpu.dot_dimension_numbers<[1], [0], [0], [1], [0, 0, 1, 1], [], []>} : vector<2x128xf32>, vector<128x128xf32>, vector<2x128xf32> -> vector<2x128xf32>
    %17 = arith.addf %15, %16 : vector<2x128xf32>
    %c4 = arith.constant 4 : index
    %c0_13 = arith.constant 0 : index
    %18 = vector.load %arg7[%c4, %c0_13] : memref<16x128xf32, #tpu.memory_space<vmem>>, vector<2x128xf32>
    tpu.vector_store %arg7[%c4, %c0_13], %17 {strides = array<i32>} : memref<16x128xf32, #tpu.memory_space<vmem>>, vector<2x128xf32>,
    %19 = vector.extract_strided_slice %6 {offsets = [4, 0], sizes = [2, 128], strides = [1, 1]} : vector<16x128xf32> to vector<2x128xf32>
    %cst_14 = arith.constant dense<0.000000e+00> : vector<2x128xf32>
    %20 = tpu.matmul %17, %8, %cst_14 {dimension_numbers = #tpu.dot_dimension_numbers<[1], [0], [0], [1], [0, 0, 1, 1], [], []>} : vector<2x128xf32>, vector<128x128xf32>, vector<2x128xf32> -> vector<2x128xf32>
    %21 = arith.addf %19, %20 : vector<2x128xf32>
    %c6 = arith.constant 6 : index
    %c0_15 = arith.constant 0 : index
    %22 = vector.load %arg7[%c6, %c0_15] : memref<16x128xf32, #tpu.memory_space<vmem>>, vector<2x128xf32>
    tpu.vector_store %arg7[%c6, %c0_15], %21 {strides = array<i32>} : memref<16x128xf32, #tpu.memory_space<vmem>>, vector<2x128xf32>,
    %23 = vector.extract_strided_slice %6 {offsets = [6, 0], sizes = [2, 128], strides = [1, 1]} : vector<16x128xf32> to vector<2x128xf32>
    %cst_16 = arith.constant dense<0.000000e+00> : vector<2x128xf32>
    %24 = tpu.matmul %21, %8, %cst_16 {dimension_numbers = #tpu.dot_dimension_numbers<[1], [0], [0], [1], [0, 0, 1, 1], [], []>} : vector<2x128xf32>, vector<128x128xf32>, vector<2x128xf32> -> vector<2x128xf32>
    %25 = arith.addf %23, %24 : vector<2x128xf32>
    %c8 = arith.constant 8 : index
    %c0_17 = arith.constant 0 : index
    %26 = vector.load %arg7[%c8, %c0_17] : memref<16x128xf32, #tpu.memory_space<vmem>>, vector<2x128xf32>
    tpu.vector_store %arg7[%c8, %c0_17], %25 {strides = array<i32>} : memref<16x128xf32, #tpu.memory_space<vmem>>, vector<2x128xf32>,
    %27 = vector.extract_strided_slice %6 {offsets = [8, 0], sizes = [2, 128], strides = [1, 1]} : vector<16x128xf32> to vector<2x128xf32>
    %cst_18 = arith.constant dense<0.000000e+00> : vector<2x128xf32>
    %28 = tpu.matmul %25, %8, %cst_18 {dimension_numbers = #tpu.dot_dimension_numbers<[1], [0], [0], [1], [0, 0, 1, 1], [], []>} : vector<2x128xf32>, vector<128x128xf32>, vector<2x128xf32> -> vector<2x128xf32>
    %29 = arith.addf %27, %28 : vector<2x128xf32>
    %c10 = arith.constant 10 : index
    %c0_19 = arith.constant 0 : index
    %30 = vector.load %arg7[%c10, %c0_19] : memref<16x128xf32, #tpu.memory_space<vmem>>, vector<2x128xf32>
    tpu.vector_store %arg7[%c10, %c0_19], %29 {strides = array<i32>} : memref<16x128xf32, #tpu.memory_space<vmem>>, vector<2x128xf32>,
    %31 = vector.extract_strided_slice %6 {offsets = [10, 0], sizes = [2, 128], strides = [1, 1]} : vector<16x128xf32> to vector<2x128xf32>
    %cst_20 = arith.constant dense<0.000000e+00> : vector<2x128xf32>
    %32 = tpu.matmul %29, %8, %cst_20 {dimension_numbers = #tpu.dot_dimension_numbers<[1], [0], [0], [1], [0, 0, 1, 1], [], []>} : vector<2x128xf32>, vector<128x128xf32>, vector<2x128xf32> -> vector<2x128xf32>
    %33 = arith.addf %31, %32 : vector<2x128xf32>
    %c12 = arith.constant 12 : index
    %c0_21 = arith.constant 0 : index
    %34 = vector.load %arg7[%c12, %c0_21] : memref<16x128xf32, #tpu.memory_space<vmem>>, vector<2x128xf32>
    tpu.vector_store %arg7[%c12, %c0_21], %33 {strides = array<i32>} : memref<16x128xf32, #tpu.memory_space<vmem>>, vector<2x128xf32>,
    %35 = vector.extract_strided_slice %6 {offsets = [12, 0], sizes = [2, 128], strides = [1, 1]} : vector<16x128xf32> to vector<2x128xf32>
    %cst_22 = arith.constant dense<0.000000e+00> : vector<2x128xf32>
    %36 = tpu.matmul %33, %8, %cst_22 {dimension_numbers = #tpu.dot_dimension_numbers<[1], [0], [0], [1], [0, 0, 1, 1], [], []>} : vector<2x128xf32>, vector<128x128xf32>, vector<2x128xf32> -> vector<2x128xf32>
    %37 = arith.addf %35, %36 : vector<2x128xf32>
    %c14 = arith.constant 14 : index
    %c0_23 = arith.constant 0 : index
    %38 = vector.load %arg7[%c14, %c0_23] : memref<16x128xf32, #tpu.memory_space<vmem>>, vector<2x128xf32>
    tpu.vector_store %arg7[%c14, %c0_23], %37 {strides = array<i32>} : memref<16x128xf32, #tpu.memory_space<vmem>>, vector<2x128xf32>,
    %c0_24 = arith.constant 0 : index
    %c0_25 = arith.constant 0 : index
    %39 = vector.load %arg7[%c0_24, %c0_25] : memref<16x128xf32, #tpu.memory_space<vmem>>, vector<16x128xf32>
    %c0_26 = arith.constant 0 : index
    %c0_27 = arith.constant 0 : index
    %40 = vector.load %arg4[%c0_26, %c0_27] : memref<128x128xf32, #tpu.memory_space<vmem>>, vector<128x128xf32>
    %cst_28 = arith.constant dense<0.000000e+00> : vector<16x128xf32>
    %41 = tpu.matmul %39, %40, %cst_28 {dimension_numbers = #tpu.dot_dimension_numbers<[1], [0], [0], [1], [0, 0, 1, 1], [], []>} : vector<16x128xf32>, vector<128x128xf32>, vector<16x128xf32> -> vector<16x128xf32>
    %42 = arith.addf %7, %41 : vector<16x128xf32>
    %cst_29 = arith.constant dense<0xFF800000> : vector<16xf32>
    %43 = vector.multi_reduction <maximumf>, %42, %cst_29 [1] : vector<16x128xf32> to vector<16xf32>
    %44 = vector.shape_cast %43 : vector<16xf32> to vector<16x1xf32>
    %45 = vector.broadcast %44 : vector<16x1xf32> to vector<16x128xf32>
    %46 = arith.subf %42, %45 : vector<16x128xf32>
    %47 = math.exp %46 : vector<16x128xf32>
    %cst_30 = arith.constant dense<0.000000e+00> : vector<16xf32>
    %48 = vector.multi_reduction <add>, %47, %cst_30 [1] : vector<16x128xf32> to vector<16xf32>
    %49 = vector.shape_cast %48 : vector<16xf32> to vector<16x1xf32>
    %50 = math.log %49 : vector<16x1xf32>
    %51 = arith.addf %44, %50 : vector<16x1xf32>
    %52 = vector.broadcast %51 : vector<16x1xf32> to vector<16x128xf32>
    %53 = arith.subf %42, %52 : vector<16x128xf32>
    %54 = vector.extract_strided_slice %53 {offsets = [0, 0], sizes = [2, 128], strides = [1, 1]} : vector<16x128xf32> to vector<2x128xf32>
    %55 = vector.shape_cast %54 : vector<2x128xf32> to vector<2x1x128xf32>
    %c0_31 = arith.constant 0 : index
    %c0_32 = arith.constant 0 : index
    %c0_33 = arith.constant 0 : index
    %56 = vector.load %arg6[%c0_31, %c0_32, %c0_33] : memref<2x8x128xf32, #tpu.memory_space<vmem>>, vector<2x1x128xf32>
    tpu.vector_store %arg6[%c0_31, %c0_32, %c0_33], %55 {strides = array<i32>} : memref<2x8x128xf32, #tpu.memory_space<vmem>>, vector<2x1x128xf32>,
    %57 = vector.extract_strided_slice %53 {offsets = [2, 0], sizes = [2, 128], strides = [1, 1]} : vector<16x128xf32> to vector<2x128xf32>
    %58 = vector.shape_cast %57 : vector<2x128xf32> to vector<2x1x128xf32>
    %c0_34 = arith.constant 0 : index
    %c1 = arith.constant 1 : index
    %c0_35 = arith.constant 0 : index
    %59 = vector.load %arg6[%c0_34, %c1, %c0_35] : memref<2x8x128xf32, #tpu.memory_space<vmem>>, vector<2x1x128xf32>
    tpu.vector_store %arg6[%c0_34, %c1, %c0_35], %58 {strides = array<i32>} : memref<2x8x128xf32, #tpu.memory_space<vmem>>, vector<2x1x128xf32>,
    %60 = vector.extract_strided_slice %53 {offsets = [4, 0], sizes = [2, 128], strides = [1, 1]} : vector<16x128xf32> to vector<2x128xf32>
    %61 = vector.shape_cast %60 : vector<2x128xf32> to vector<2x1x128xf32>
    %c0_36 = arith.constant 0 : index
    %c2_37 = arith.constant 2 : index
    %c0_38 = arith.constant 0 : index
    %62 = vector.load %arg6[%c0_36, %c2_37, %c0_38] : memref<2x8x128xf32, #tpu.memory_space<vmem>>, vector<2x1x128xf32>
    tpu.vector_store %arg6[%c0_36, %c2_37, %c0_38], %61 {strides = array<i32>} : memref<2x8x128xf32, #tpu.memory_space<vmem>>, vector<2x1x128xf32>,
    %63 = vector.extract_strided_slice %53 {offsets = [6, 0], sizes = [2, 128], strides = [1, 1]} : vector<16x128xf32> to vector<2x128xf32>
    %64 = vector.shape_cast %63 : vector<2x128xf32> to vector<2x1x128xf32>
    %c0_39 = arith.constant 0 : index
    %c3 = arith.constant 3 : index
    %c0_40 = arith.constant 0 : index
    %65 = vector.load %arg6[%c0_39, %c3, %c0_40] : memref<2x8x128xf32, #tpu.memory_space<vmem>>, vector<2x1x128xf32>
    tpu.vector_store %arg6[%c0_39, %c3, %c0_40], %64 {strides = array<i32>} : memref<2x8x128xf32, #tpu.memory_space<vmem>>, vector<2x1x128xf32>,
    %66 = vector.extract_strided_slice %53 {offsets = [8, 0], sizes = [2, 128], strides = [1, 1]} : vector<16x128xf32> to vector<2x128xf32>
    %67 = vector.shape_cast %66 : vector<2x128xf32> to vector<2x1x128xf32>
    %c0_41 = arith.constant 0 : index
    %c4_42 = arith.constant 4 : index
    %c0_43 = arith.constant 0 : index
    %68 = vector.load %arg6[%c0_41, %c4_42, %c0_43] : memref<2x8x128xf32, #tpu.memory_space<vmem>>, vector<2x1x128xf32>
    tpu.vector_store %arg6[%c0_41, %c4_42, %c0_43], %67 {strides = array<i32>} : memref<2x8x128xf32, #tpu.memory_space<vmem>>, vector<2x1x128xf32>,
    %69 = vector.extract_strided_slice %53 {offsets = [10, 0], sizes = [2, 128], strides = [1, 1]} : vector<16x128xf32> to vector<2x128xf32>
    %70 = vector.shape_cast %69 : vector<2x128xf32> to vector<2x1x128xf32>
    %c0_44 = arith.constant 0 : index
    %c5 = arith.constant 5 : index
    %c0_45 = arith.constant 0 : index
    %71 = vector.load %arg6[%c0_44, %c5, %c0_45] : memref<2x8x128xf32, #tpu.memory_space<vmem>>, vector<2x1x128xf32>
    tpu.vector_store %arg6[%c0_44, %c5, %c0_45], %70 {strides = array<i32>} : memref<2x8x128xf32, #tpu.memory_space<vmem>>, vector<2x1x128xf32>,
    %72 = vector.extract_strided_slice %53 {offsets = [12, 0], sizes = [2, 128], strides = [1, 1]} : vector<16x128xf32> to vector<2x128xf32>
    %73 = vector.shape_cast %72 : vector<2x128xf32> to vector<2x1x128xf32>
    %c0_46 = arith.constant 0 : index
    %c6_47 = arith.constant 6 : index
    %c0_48 = arith.constant 0 : index
    %74 = vector.load %arg6[%c0_46, %c6_47, %c0_48] : memref<2x8x128xf32, #tpu.memory_space<vmem>>, vector<2x1x128xf32>
    tpu.vector_store %arg6[%c0_46, %c6_47, %c0_48], %73 {strides = array<i32>} : memref<2x8x128xf32, #tpu.memory_space<vmem>>, vector<2x1x128xf32>,
    %75 = vector.extract_strided_slice %53 {offsets = [14, 0], sizes = [2, 128], strides = [1, 1]} : vector<16x128xf32> to vector<2x128xf32>
    %76 = vector.shape_cast %75 : vector<2x128xf32> to vector<2x1x128xf32>
    %c0_49 = arith.constant 0 : index
    %c7 = arith.constant 7 : index
    %c0_50 = arith.constant 0 : index
    %77 = vector.load %arg6[%c0_49, %c7, %c0_50] : memref<2x8x128xf32, #tpu.memory_space<vmem>>, vector<2x1x128xf32>
    tpu.vector_store %arg6[%c0_49, %c7, %c0_50], %76 {strides = array<i32>} : memref<2x8x128xf32, #tpu.memory_space<vmem>>, vector<2x1x128xf32>,
    return
  }
  func.func @transform_0(%arg0: i32) -> (i32, i32) {
    %c0_i32 = arith.constant 0 : i32
    %c0_i32_0 = arith.constant 0 : i32
    %c0_i32_1 = arith.constant 0 : i32
    return %c0_i32, %c0_i32_0 : i32, i32
  }
  func.func @transform_1(%arg0: i32) -> (i32, i32) {
    %c0_i32 = arith.constant 0 : i32
    %c0_i32_0 = arith.constant 0 : i32
    %c0_i32_1 = arith.constant 0 : i32
    return %c0_i32, %c0_i32_0 : i32, i32
  }
  func.func @transform_2(%arg0: i32) -> (i32, i32) {
    %c0_i32 = arith.constant 0 : i32
    %c0_i32_0 = arith.constant 0 : i32
    %c0_i32_1 = arith.constant 0 : i32
    return %c0_i32, %c0_i32_0 : i32, i32
  }
  func.func @transform_3(%arg0: i32) -> (i32, i32) {
    %c0_i32 = arith.constant 0 : i32
    %c0_i32_0 = arith.constant 0 : i32
    %c0_i32_1 = arith.constant 0 : i32
    return %c0_i32, %c0_i32_0 : i32, i32
  }
  func.func @transform_4(%arg0: i32) -> (i32, i32) {
    %c0_i32 = arith.constant 0 : i32
    %c0_i32_0 = arith.constant 0 : i32
    %c0_i32_1 = arith.constant 0 : i32
    return %c0_i32, %c0_i32_0 : i32, i32
  }
  func.func @transform_5(%arg0: i32) -> (i32, i32, i32) {
    %c0_i32 = arith.constant 0 : i32
    %c0_i32_0 = arith.constant 0 : i32
    %c0_i32_1 = arith.constant 0 : i32
    %c0_i32_2 = arith.constant 0 : i32
    return %c0_i32, %c0_i32_0, %c0_i32_1 : i32, i32, i32
  }
}

</mosaic_0001>

<bundles_post_ra>
// kernel: tpu_custom_call.1
= control target key start
LH: loop header
LB: loop body
LE: loop exit
PB: predicated region body
PF: predicated region fallthrough
CT: control target
= control target key end

     0   :  { %10 = vsyncpa [#allocation4], 0  ;;  %s1934_s0 = inlined_call_operand.hbm [shape: f32[16,32], index: 0, kind: input, shape index: {}]   ;;  %s1935_s1 = inlined_call_operand.hbm [shape: f32[32,256], index: 1, kind: input, shape index: {}]   ;;  %s1936_s2 = inlined_call_operand.hbm [shape: f32[128,128], index: 2, kind: input, shape index: {}]   ;;  %s1937_s3 = inlined_call_operand.hbm [shape: f32[128,128], index: 3, kind: input, shape index: {}]   ;;  %s1938_s4 = inlined_call_operand.vmem [shape: f32[1,256], index: 4, kind: input, shape index: {}]   ;;  %s1939_s5 = inlined_call_operand.hbm [shape: f32[2,8,128], index: 5, kind: output, shape index: {}]  }
   0x1   :  { %11 = vsyncpa [#allocation7], 0 }
   0x2   :  { %12 = vsyncpa [#allocation10], 0 }
   0x3   :  { %13 = vsyncpa [#allocation5], 0  ;;  %s1553_s18 = smov [#allocation6]  }
   0x4   :  { %s31_s19 = sshll.u32 %s1553_s18, 4  ;;  %s32_s19 = int_to_ptr.vmem [resolvable:$true] %s31_s19 }
   0x5   :  { %s1453_s20 = scalar_lea.vmem %s32_s19, 1024  ;;  %p1458_p1 = scmp.lt.s32.totalorder %s32_s19, %s32_s19 }
   0x6   :  { %p1454_p0 = scmp.ne.s32.totalorder %s32_s19, %s1453_s20  ;;  %p1459_p2 = scmp.lt.s32.totalorder %s1453_s20, %s1453_s20 }
   0x8   :  { %p1460_p3 = por %p1459_p2, %p1458_p1 }
   0xa   :  { %p1461_p4 = pnand %p1460_p3, %p1454_p0 }
   0xc   :  { %1464 = shalt.err (!%p1461_p4)
}
   0xd   :  { %s1554_s21 = smov 256   ;;  %s1555_s22 = smov 16  }
   0xe   :  { %37 = dma.hbm_to_vmem [thread:$0]  %s1935_s1, 1024, %s32_s19, [#allocation7], %s1554_s21, %s1554_s21, %s1555_s22  }
   0xf   :  { %s1556_s25 = smov [#allocation3]  }
  0x10   :  { %s19_s26 = sshll.u32 %s1556_s25, 4  ;;  %s20_s26 = int_to_ptr.vmem [resolvable:$true] %s19_s26 }
  0x11   :  { %s1473_s27 = scalar_lea.vmem %s20_s26, 256  ;;  %p1478_p6 = scmp.lt.s32.totalorder %s20_s26, %s20_s26 }
  0x12   :  { %p1474_p5 = scmp.ne.s32.totalorder %s20_s26, %s1473_s27  ;;  %p1479_p7 = scmp.lt.s32.totalorder %s1473_s27, %s1473_s27 }
  0x14   :  { %p1480_p8 = por %p1479_p7, %p1478_p6 }
  0x16   :  { %p1481_p9 = pnand %p1480_p8, %p1474_p5 }
  0x18   :  { %1484 = shalt.err (!%p1481_p9)
}
  0x19   :  { %s1557_s28 = smov 128   ;;  %s1558_s29 = smov 8  }
  0x1a   :  { %25 = dma.hbm_to_vmem [thread:$0]  %s1934_s0, 256, %s20_s26, [#allocation4], %s1557_s28, %s1557_s28, %s1558_s29  }
  0x1b   :  { %s1559_s1 = smov [#allocation8]   ;;  %s1560_s8 = smov [#allocation9]  }
  0x1c   :  { %s43_s7 = sshll.u32 %s1559_s1, 4  ;;  %s55_s9 = sshll.u32 %s1560_s8, 4  ;;  %s44_s7 = int_to_ptr.vmem [resolvable:$true] %s43_s7  ;;  %s56_s9 = int_to_ptr.vmem [resolvable:$true] %s55_s9 }
  0x1d   :  { %s1493_s10 = scalar_lea.vmem %s44_s7, 2048  ;;  %p1498_p11 = scmp.lt.s32.totalorder %s44_s7, %s44_s7 }
  0x1e   :  { %p1494_p10 = scmp.ne.s32.totalorder %s44_s7, %s1493_s10  ;;  %p1499_p12 = scmp.lt.s32.totalorder %s1493_s10, %s1493_s10 }
  0x20   :  { %p1500_p13 = por %p1499_p12, %p1498_p11 }
  0x22   :  { %p1501_p0 = pnand %p1500_p13, %p1494_p10 }
  0x24   :  { %1504 = shalt.err (!%p1501_p0)
}
  0x25   :  { %49 = dma.hbm_to_vmem [thread:$0]  %s1936_s2, 2048, %s44_s7, [#allocation7], %s1557_s28, %s1557_s28, %s1558_s29  }
  0x26   :  { %s1513_s0 = scalar_lea.vmem %s56_s9, 2048  ;;  %p1518_p2 = scmp.lt.s32.totalorder %s56_s9, %s56_s9 }
  0x27   :  { %p1514_p1 = scmp.ne.s32.totalorder %s56_s9, %s1513_s0  ;;  %p1519_p3 = scmp.lt.s32.totalorder %s1513_s0, %s1513_s0 }
  0x29   :  { %p1520_p4 = por %p1519_p3, %p1518_p2 }
  0x2b   :  { %p1521_p5 = pnand %p1520_p4, %p1514_p1 }
  0x2d   :  { %1524 = shalt.err (!%p1521_p5)
}
  0x2e   :  { %61 = dma.hbm_to_vmem [thread:$0]  %s1937_s3, 2048, %s56_s9, [#allocation10], %s1557_s28, %s1557_s28, %s1558_s29  }
  0x2f   :  { %1545 = dma.done.wait [#allocation4], 256  }
  0x30   :  { %1546 = vsyncadd [#allocation4], 4294967040 }
  0x31   :  { %1547 = dma.done.wait [#allocation7], 3072  }
  0x32   :  { %1548 = vsyncadd [#allocation7], 4294964224 }
  0x33   :  { %1549 = dma.done.wait [#allocation10], 2048  }
  0x34   :  { %1550 = vsyncadd [#allocation10], 4294965248  ;;  %v1561_v0 = vmov 0.0   ;;  %vm1562_vm0 = vmmov 0   ;;  %v1621_v1 = vld [vmem:[#allocation8 + $0x78] sm:$0xff]  ;;  %v1623_v2 = vld [vmem:[#allocation8 + $0x70] sm:$0xff]  ;;  %v88_v27 = vlaneseq }
  0x35   :  { %1145 = vmatprep.subr.mxu1 %v1561_v0  ;;  %198 = vst [vmem:[#allocation2] sm:$0x3] %v1561_v0  ;;  %169 = vmatprep.mubr.f32.mxu0 %v1561_v0  ;;  %v1627_v3 = vld [vmem:[#allocation8 + $0x68] sm:$0xff]  ;;  %v85_v4 = vld [vmem:[#allocation6 + $0x38] sm:$0xff]  ;;  %v84_v5 = vld [vmem:[#allocation6 + $0x30] sm:$0xff]  ;;  %vm98_vm1 = vcmask 261120  }
  0x36   :  { %1177 = vmatprep.mubr.msk.f32.mxu1 %vm1562_vm0, %v1561_v0  ;;  %1146 = vmatpush3.msra.mxu1 %v1621_v1  ;;  %v1631_v6 = vld [vmem:[#allocation8 + $0x60] sm:$0xff]  ;;  %v83_v7 = vld [vmem:[#allocation6 + $0x28] sm:$0xff]  ;;  %v81_v9 = vld [vmem:[#allocation6 + $0x18] sm:$0xff]  ;;  %v1758_v28 = vshrl.u32 %v88_v27, 7 }
  0x37   :  { %1147 = vmatprep.subr.mxu1 %v1561_v0  ;;  %129 = vmatprep.subr.mxu0 %v85_v4  ;;  %v82_v8 = vld [vmem:[#allocation6 + $0x20] sm:$0xff]  ;;  %v1635_v10 = vld [vmem:[#allocation8 + $0x58] sm:$0xff]  ;;  %v80_v11 = vld [vmem:[#allocation6 + $0x10] sm:$0xff] }
  0x38   :  { %1148 = vmatpush3.msra.mxu1 %v1623_v2  ;;  %130 = vmatpush1.msra.mxu0 %v84_v5  ;;  %v79_v12 = vld [vmem:[#allocation6 + $0x8] sm:$0xff]  ;;  %v1639_v13 = vld [vmem:[#allocation8 + $0x50] sm:$0xff]  ;;  %v78_v14 = vld [vmem:[#allocation6] sm:$0xff]  ;;  %v90_v29 = vsub.s32 0, %v1758_v28 }
  0x39   :  { %1149 = vmatprep.subr.mxu1 %v1561_v0  ;;  %131 = vmatprep.subr.mxu0 %v83_v7  ;;  %v76_v15 = vld [vmem:[#allocation3] sm:$0xff]  ;;  %v1643_v16 = vld [vmem:[#allocation8 + $0x48] sm:$0xff]  ;;  %v1647_v17 = vld [vmem:[#allocation8 + $0x40] sm:$0xff] }
  0x3a   :  { %1150 = vmatpush3.msra.mxu1 %v1627_v3  ;;  %132 = vmatpush1.msra.mxu0 %v82_v8  ;;  %v1653_v18 = vld [vmem:[#allocation8 + $0x38] sm:$0xff]  ;;  %v1659_v19 = vld [vmem:[#allocation8 + $0x30] sm:$0xff]  ;;  %v1665_v20 = vld [vmem:[#allocation8 + $0x28] sm:$0xff] }
  0x3b   :  { %1151 = vmatprep.subr.mxu1 %v1561_v0  ;;  %133 = vmatprep.subr.mxu0 %v81_v9  ;;  %v1671_v21 = vld [vmem:[#allocation8 + $0x20] sm:$0xff]  ;;  %v1677_v22 = vld [vmem:[#allocation8 + $0x18] sm:$0xff]  ;;  %v1683_v23 = vld [vmem:[#allocation8 + $0x10] sm:$0xff] }
  0x3c   :  { %1152 = vmatpush3.msra.mxu1 %v1631_v6  ;;  %134 = vmatpush1.msra.mxu0 %v80_v11  ;;  %v1689_v24 = vld [vmem:[#allocation8 + $0x8] sm:$0xff]  ;;  %v1695_v25 = vld [vmem:[#allocation8] sm:$0xff]  ;;  %v77_v26 = vld [vmem:[#allocation3 + $0x8] sm:$0xff] }
  0x3d   :  { %1153 = vmatprep.subr.mxu1 %v1561_v0  ;;  %135 = vmatprep.subr.mxu0 %v79_v12  ;;  %v1764_v30 = vld [vmem:[%s1938_s4] sm:$0x3]  ;;  %v747_v60 = vld [vmem:[#allocation9 + $0x78] sm:$0xff]  ;;  %v746_v61 = vld [vmem:[#allocation9 + $0x70] sm:$0xff]  ;;  %s1564_s4 = smov [#allocation11]  }
  0x3e   :  { %1154 = vmatpush3.msra.mxu1 %v1635_v10  ;;  %136 = vmatpush1.msra.mxu0 %v78_v14  ;;  %v1767_v31 = vrot.slane %v1764_v30, %v90_v29  ;;  %v745_v62 = vld [vmem:[#allocation9 + $0x68] sm:$0xff]  ;;  %v744_v63 = vld [vmem:[#allocation9 + $0x60] sm:$0xff]  ;;  %v739_v4 = vld [vmem:[#allocation9 + $0x38] sm:$0xff]  ;;  %s984_s15 = sshll.u32 %s1564_s4, 4  ;;  %s985_s15 = int_to_ptr.vmem [resolvable:$true] %s984_s15 }
  0x3f   :  { %1155 = vmatprep.subr.mxu1 %v1561_v0  ;;  %998 = vmatmul.mubr.msk.f32.vlgmr.msra.gmra.mxu0 %vm98_vm1, %v76_v15  ;;  %v738_v5 = vld [vmem:[#allocation9 + $0x30] sm:$0xff]  ;;  %v737_v11 = vld [vmem:[#allocation9 + $0x28] sm:$0xff]  ;;  %v736_v12 = vld [vmem:[#allocation9 + $0x20] sm:$0xff]  ;;  %s1525_s16 = scalar_lea.vmem %s985_s15, 256  ;;  %p1530_p7 = scmp.lt.s32.totalorder %s985_s15, %s985_s15 }
  0x40   :  { %1156 = vmatpush3.msra.mxu1 %v1639_v13  ;;  %1180 = vmatprep.subr.mxu0 %v1561_v0  ;;  %v734_v14 = vld [vmem:[#allocation9 + $0x10] sm:$0xff]  ;;  %v733_v15 = vld [vmem:[#allocation9 + $0x8] sm:$0xff]  ;;  %p1526_p6 = scmp.ne.s32.totalorder %s985_s15, %s1525_s16  ;;  %p1531_p8 = scmp.lt.s32.totalorder %s1525_s16, %s1525_s16 }
  0x41   :  { %1157 = vmatprep.subr.mxu1 %v1561_v0  ;;  %1181 = vmatpush3.msra.mxu0 %v1621_v1 }
  0x42   :  { %1158 = vmatpush3.msra.mxu1 %v1643_v16  ;;  %1182 = vmatprep.subr.mxu0 %v1561_v0  ;;  %p1532_p9 = por %p1531_p8, %p1530_p7 }
  0x43   :  { %1159 = vmatprep.subr.mxu1 %v1561_v0  ;;  %1183 = vmatpush3.msra.mxu0 %v1623_v2 }
  0x44   :  { %1160 = vmatpush3.msra.mxu1 %v1647_v17  ;;  %1184 = vmatprep.subr.mxu0 %v1561_v0  ;;  %p1533_p10 = pnand %p1532_p9, %p1526_p6 }
  0x45   :  { %1161 = vmatprep.subr.mxu1 %v1561_v0  ;;  %1185 = vmatpush3.msra.mxu0 %v1627_v3 }
  0x46   :  { %1162 = vmatpush3.msra.mxu1 %v1653_v18  ;;  %1186 = vmatprep.subr.mxu0 %v1561_v0 }
  0x47   :  { %1163 = vmatprep.subr.mxu1 %v1561_v0  ;;  %1187 = vmatpush3.msra.mxu0 %v1631_v6 }
  0x48   :  { %1164 = vmatpush3.msra.mxu1 %v1659_v19  ;;  %1188 = vmatprep.subr.mxu0 %v1561_v0 }
  0x49   :  { %1165 = vmatprep.subr.mxu1 %v1561_v0  ;;  %1189 = vmatpush3.msra.mxu0 %v1635_v10 }
  0x4a   :  { %1166 = vmatpush3.msra.mxu1 %v1665_v20  ;;  %1190 = vmatprep.subr.mxu0 %v1561_v0 }
  0x4b   :  { %1167 = vmatprep.subr.mxu1 %v1561_v0  ;;  %1191 = vmatpush3.msra.mxu0 %v1639_v13 }
  0x4c   :  { %1168 = vmatpush3.msra.mxu1 %v1671_v21  ;;  %1192 = vmatprep.subr.mxu0 %v1561_v0 }
  0x4d   :  { %1169 = vmatprep.subr.mxu1 %v1561_v0  ;;  %1193 = vmatpush3.msra.mxu0 %v1643_v16 }
  0x4e   :  { %1170 = vmatpush3.msra.mxu1 %v1677_v22  ;;  %1194 = vmatprep.subr.mxu0 %v1561_v0 }
  0x4f   :  { %1171 = vmatprep.subr.mxu1 %v1561_v0  ;;  %1195 = vmatpush3.msra.mxu0 %v1647_v17 }
  0x50   :  { %1172 = vmatpush3.msra.mxu1 %v1683_v23  ;;  %1196 = vmatprep.subr.mxu0 %v1561_v0 }
  0x51   :  { %1173 = vmatprep.subr.mxu1 %v1561_v0  ;;  %1197 = vmatpush3.msra.mxu0 %v1653_v18 }
  0x52   :  { %1174 = vmatpush3.msra.mxu1 %v1689_v24  ;;  %1198 = vmatprep.subr.mxu0 %v1561_v0 }
  0x53   :  { %1175 = vmatprep.subr.mxu1 %v1561_v0  ;;  %1199 = vmatpush3.msra.mxu0 %v1659_v19 }
  0x54   :  { %1176 = vmatpush3.msra.mxu1 %v1695_v25  ;;  %1200 = vmatprep.subr.mxu0 %v1561_v0 }
  0x55   :  { %1178 = vmatmul.mubr.f32.vlgmr.msra.gmra.mxu1 %v1561_v0  ;;  %175 = vmatprep.mubr.f32.mxu0 %v1561_v0 }
  0x56   :  { %1201 = vmatpush3.msra.mxu0 %v1665_v20  ;;  %1215 = vmatprep.subr.mxu1 %v1561_v0 }
  0x57   :  { %1202 = vmatprep.subr.mxu0 %v1561_v0  ;;  %1216 = vmatpush3.msra.mxu1 %v1621_v1 }
  0x58   :  { %1203 = vmatpush3.msra.mxu0 %v1671_v21  ;;  %1217 = vmatprep.subr.mxu1 %v1561_v0 }
  0x59   :  { %1204 = vmatprep.subr.mxu0 %v1561_v0  ;;  %1218 = vmatpush3.msra.mxu1 %v1623_v2 }
  0x5a   :  { %1205 = vmatpush3.msra.mxu0 %v1677_v22  ;;  %1219 = vmatprep.subr.mxu1 %v1561_v0 }
  0x5b   :  { %1206 = vmatprep.subr.mxu0 %v1561_v0  ;;  %1220 = vmatpush3.msra.mxu1 %v1627_v3 }
  0x5c   :  { %1207 = vmatpush3.msra.mxu0 %v1683_v23  ;;  %1221 = vmatprep.subr.mxu1 %v1561_v0 }
  0x5d   :  { %1208 = vmatprep.subr.mxu0 %v1561_v0  ;;  %1222 = vmatpush3.msra.mxu1 %v1631_v6 }
  0x5e   :  { %1209 = vmatpush3.msra.mxu0 %v1689_v24  ;;  %1223 = vmatprep.subr.mxu1 %v1561_v0 }
  0x5f   :  { %1210 = vmatprep.subr.mxu0 %v1561_v0  ;;  %1224 = vmatpush3.msra.mxu1 %v1635_v10 }
  0x60   :  { %1211 = vmatpush3.msra.mxu0 %v1695_v25  ;;  %1225 = vmatprep.subr.mxu1 %v1561_v0 }
  0x61   :  { %1226 = vmatpush3.msra.mxu1 %v1639_v13  ;;  %1247 = vmatprep.mubr.msk.f32.mxu1 %vm1562_vm0, %v1561_v0 }
  0x62   :  { %1227 = vmatprep.subr.mxu1 %v1561_v0  ;;  %1250 = vmatprep.subr.mxu0 %v1561_v0 }
  0x63   :  { %1228 = vmatpush3.msra.mxu1 %v1643_v16  ;;  %999 = vmatmul.mubr.msk.f32.gmra.mxu0 %vm98_vm1, %v77_v26 }
  0x64   :  { %1229 = vmatprep.subr.mxu1 %v1561_v0  ;;  %1212 = vmatprep.mubr.msk.f32.mxu0 %vm1562_vm0, %v1561_v0 }
  0x65   :  { %1230 = vmatpush3.msra.mxu1 %v1647_v17 }
  0x66   :  { %1231 = vmatprep.subr.mxu1 %v1561_v0 }
  0x67   :  { %1232 = vmatpush3.msra.mxu1 %v1653_v18 }
  0x68   :  { %1233 = vmatprep.subr.mxu1 %v1561_v0 }
  0x69   :  { %1234 = vmatpush3.msra.mxu1 %v1659_v19 }
  0x6a   :  { %1235 = vmatprep.subr.mxu1 %v1561_v0 }
  0x6b   :  { %1236 = vmatpush3.msra.mxu1 %v1665_v20 }
  0x6c   :  { %1237 = vmatprep.subr.mxu1 %v1561_v0 }
  0x6d   :  { %1238 = vmatpush3.msra.mxu1 %v1671_v21 }
  0x6e   :  { %1239 = vmatprep.subr.mxu1 %v1561_v0 }
  0x6f   :  { %1240 = vmatpush3.msra.mxu1 %v1677_v22 }
  0x70   :  { %1241 = vmatprep.subr.mxu1 %v1561_v0 }
  0x71   :  { %1242 = vmatpush3.msra.mxu1 %v1683_v23 }
  0x72   :  { %1243 = vmatprep.subr.mxu1 %v1561_v0 }
  0x73   :  { %1244 = vmatpush3.msra.mxu1 %v1689_v24 }
  0x74   :  { %1245 = vmatprep.subr.mxu1 %v1561_v0 }
  0x75   :  { %1246 = vmatpush3.msra.mxu1 %v1695_v25 }
  0x76   :  { %1285 = vmatprep.subr.mxu1 %v1561_v0 }
  0xff   :  { %v171_v32 = vpop.f32.mrf.mxu0 }
 0x100   :  { %v1770_v33 = vadd.f32 %v171_v32, %v1767_v31 }
 0x101   :  { %v1807_v37 = vpop.f32.mrf.mxu0 }
 0x115   :  { %v265_v34 = vpop.f32.mrf.mxu1 }
 0x116   :  { %v269_v35 = vadd.f32 %v265_v34, %v1770_v33 }
 0x117   :  { %v1179_v36 = vpop.f32.mrf.mxu1 }
 0x118   :  { %270 = vst [vmem:[#allocation2 + $0x2] sm:$0x3] %v269_v35  ;;  %1213 = vmatmul.mubr.f32.vlgmr.msra.gmra.mxu0 %v269_v35 }
 0x119   :  { %1251 = vmatpush3.msra.mxu0 %v1621_v1  ;;  %1282 = vmatprep.mubr.msk.f32.mxu0 %vm1562_vm0, %v1561_v0 }
 0x11a   :  { %1252 = vmatprep.subr.mxu0 %v1561_v0 }
 0x11b   :  { %1253 = vmatpush3.msra.mxu0 %v1623_v2 }
 0x11c   :  { %1254 = vmatprep.subr.mxu0 %v1561_v0 }
 0x11d   :  { %1255 = vmatpush3.msra.mxu0 %v1627_v3 }
 0x11e   :  { %1256 = vmatprep.subr.mxu0 %v1561_v0 }
 0x11f   :  { %1257 = vmatpush3.msra.mxu0 %v1631_v6 }
 0x120   :  { %1258 = vmatprep.subr.mxu0 %v1561_v0 }
 0x121   :  { %1259 = vmatpush3.msra.mxu0 %v1635_v10 }
 0x122   :  { %1260 = vmatprep.subr.mxu0 %v1561_v0 }
 0x123   :  { %1261 = vmatpush3.msra.mxu0 %v1639_v13  ;;  %v1809_v38 = vpop.f32.mrf.mxu0 }
 0x124   :  { %1262 = vmatprep.subr.mxu0 %v1561_v0  ;;  %v1918_v55 = vadd.f32 %v1809_v38, %v1767_v31 }
 0x125   :  { %1263 = vmatpush3.msra.mxu0 %v1643_v16  ;;  %v1811_v39 = vpop.f32.mrf.mxu0 }
 0x126   :  { %1264 = vmatprep.subr.mxu0 %v1561_v0 }
 0x127   :  { %1265 = vmatpush3.msra.mxu0 %v1647_v17 }
 0x128   :  { %1266 = vmatprep.subr.mxu0 %v1561_v0 }
 0x129   :  { %1267 = vmatpush3.msra.mxu0 %v1653_v18 }
 0x12a   :  { %1268 = vmatprep.subr.mxu0 %v1561_v0 }
 0x12b   :  { %1269 = vmatpush3.msra.mxu0 %v1659_v19 }
 0x12c   :  { %1270 = vmatprep.subr.mxu0 %v1561_v0 }
 0x12d   :  { %1271 = vmatpush3.msra.mxu0 %v1665_v20 }
 0x12e   :  { %1272 = vmatprep.subr.mxu0 %v1561_v0 }
 0x12f   :  { %1273 = vmatpush3.msra.mxu0 %v1671_v21 }
 0x130   :  { %1274 = vmatprep.subr.mxu0 %v1561_v0 }
 0x131   :  { %1275 = vmatpush3.msra.mxu0 %v1677_v22 }
 0x132   :  { %1276 = vmatprep.subr.mxu0 %v1561_v0 }
 0x133   :  { %1277 = vmatpush3.msra.mxu0 %v1683_v23 }
 0x134   :  { %1278 = vmatprep.subr.mxu0 %v1561_v0 }
 0x135   :  { %1279 = vmatpush3.msra.mxu0 %v1689_v24 }
 0x136   :  { %1280 = vmatprep.subr.mxu0 %v1561_v0 }
 0x137   :  { %1281 = vmatpush3.msra.mxu0 %v1695_v25 }
 0x138   :  { %1320 = vmatprep.subr.mxu0 %v1561_v0 }
 0x1d8   :  { %v337_v40 = vpop.f32.mrf.mxu0 }
 0x1d9   :  { %v342_v41 = vrot.slane %v337_v40, 6 }
 0x1da   :  { %v1214_v42 = vpop.f32.mrf.mxu0 }
 0x1db   :  { %v344_v43 = vadd.f32 %v342_v41, %v1770_v33 }
 0x1dd   :  { %345 = vst [vmem:[#allocation2 + $0x2] sm:$0xc] %v344_v43  ;;  %v347_v44 = vrot.slane %v344_v43, 2 }
 0x1df   :  { %1248 = vmatmul.mubr.f32.vlgmr.msra.gmra.mxu1 %v347_v44 }
 0x1e0   :  { %1286 = vmatpush3.msra.mxu1 %v1621_v1  ;;  %1317 = vmatprep.mubr.msk.f32.mxu1 %vm1562_vm0, %v1561_v0 }
 0x1e1   :  { %1287 = vmatprep.subr.mxu1 %v1561_v0 }
 0x1e2   :  { %1288 = vmatpush3.msra.mxu1 %v1623_v2 }
 0x1e3   :  { %1289 = vmatprep.subr.mxu1 %v1561_v0 }
 0x1e4   :  { %1290 = vmatpush3.msra.mxu1 %v1627_v3 }
 0x1e5   :  { %1291 = vmatprep.subr.mxu1 %v1561_v0 }
 0x1e6   :  { %1292 = vmatpush3.msra.mxu1 %v1631_v6 }
 0x1e7   :  { %1293 = vmatprep.subr.mxu1 %v1561_v0 }
 0x1e8   :  { %1294 = vmatpush3.msra.mxu1 %v1635_v10 }
 0x1e9   :  { %1295 = vmatprep.subr.mxu1 %v1561_v0 }
 0x1ea   :  { %1296 = vmatpush3.msra.mxu1 %v1639_v13 }
 0x1eb   :  { %1297 = vmatprep.subr.mxu1 %v1561_v0 }
 0x1ec   :  { %1298 = vmatpush3.msra.mxu1 %v1643_v16 }
 0x1ed   :  { %1299 = vmatprep.subr.mxu1 %v1561_v0 }
 0x1ee   :  { %1300 = vmatpush3.msra.mxu1 %v1647_v17 }
 0x1ef   :  { %1301 = vmatprep.subr.mxu1 %v1561_v0 }
 0x1f0   :  { %1302 = vmatpush3.msra.mxu1 %v1653_v18 }
 0x1f1   :  { %1303 = vmatprep.subr.mxu1 %v1561_v0 }
 0x1f2   :  { %1304 = vmatpush3.msra.mxu1 %v1659_v19 }
 0x1f3   :  { %1305 = vmatprep.subr.mxu1 %v1561_v0 }
 0x1f4   :  { %1306 = vmatpush3.msra.mxu1 %v1665_v20 }
 0x1f5   :  { %1307 = vmatprep.subr.mxu1 %v1561_v0 }
 0x1f6   :  { %1308 = vmatpush3.msra.mxu1 %v1671_v21 }
 0x1f7   :  { %1309 = vmatprep.subr.mxu1 %v1561_v0 }
 0x1f8   :  { %1310 = vmatpush3.msra.mxu1 %v1677_v22 }
 0x1f9   :  { %1311 = vmatprep.subr.mxu1 %v1561_v0 }
 0x1fa   :  { %1312 = vmatpush3.msra.mxu1 %v1683_v23 }
 0x1fb   :  { %1313 = vmatprep.subr.mxu1 %v1561_v0 }
 0x1fc   :  { %1314 = vmatpush3.msra.mxu1 %v1689_v24 }
 0x1fd   :  { %1315 = vmatprep.subr.mxu1 %v1561_v0 }
 0x1fe   :  { %1316 = vmatpush3.msra.mxu1 %v1695_v25 }
 0x1ff   :  { %1355 = vmatprep.subr.mxu1 %v1561_v0 }
 0x29f   :  { %v415_v45 = vpop.f32.mrf.mxu1 }
 0x2a0   :  { %v420_v46 = vrot.slane %v415_v45, 4 }
 0x2a1   :  { %v1249_v47 = vpop.f32.mrf.mxu1 }
 0x2a2   :  { %v422_v48 = vadd.f32 %v420_v46, %v1770_v33 }
 0x2a4   :  { %423 = vst [vmem:[#allocation2 + $0x2] sm:$0x30] %v422_v48  ;;  %v425_v49 = vrot.slane %v422_v48, 4 }
 0x2a6   :  { %1283 = vmatmul.mubr.f32.vlgmr.msra.gmra.mxu0 %v425_v49 }
 0x2a7   :  { %1321 = vmatpush3.msra.mxu0 %v1621_v1  ;;  %1352 = vmatprep.mubr.msk.f32.mxu0 %vm1562_vm0, %v1561_v0 }
 0x2a8   :  { %1322 = vmatprep.subr.mxu0 %v1561_v0 }
 0x2a9   :  { %1323 = vmatpush3.msra.mxu0 %v1623_v2 }
 0x2aa   :  { %1324 = vmatprep.subr.mxu0 %v1561_v0 }
 0x2ab   :  { %1325 = vmatpush3.msra.mxu0 %v1627_v3  ;;  %v730_v59 = vld [vmem:[#allocation2] sm:$0xff] }
 0x2ac   :  { %1326 = vmatprep.subr.mxu0 %v1561_v0 }
 0x2ad   :  { %1327 = vmatpush3.msra.mxu0 %v1631_v6 }
 0x2ae   :  { %1328 = vmatprep.subr.mxu0 %v1561_v0 }
 0x2af   :  { %1329 = vmatpush3.msra.mxu0 %v1635_v10 }
 0x2b0   :  { %1330 = vmatprep.subr.mxu0 %v1561_v0 }
 0x2b1   :  { %1331 = vmatpush3.msra.mxu0 %v1639_v13 }
 0x2b2   :  { %1332 = vmatprep.subr.mxu0 %v1561_v0 }
 0x2b3   :  { %1333 = vmatpush3.msra.mxu0 %v1643_v16 }
 0x2b4   :  { %1334 = vmatprep.subr.mxu0 %v1561_v0 }
 0x2b5   :  { %1335 = vmatpush3.msra.mxu0 %v1647_v17 }
 0x2b6   :  { %1336 = vmatprep.subr.mxu0 %v1561_v0 }
 0x2b7   :  { %1337 = vmatpush3.msra.mxu0 %v1653_v18 }
 0x2b8   :  { %1338 = vmatprep.subr.mxu0 %v1561_v0 }
 0x2b9   :  { %1339 = vmatpush3.msra.mxu0 %v1659_v19 }
 0x2ba   :  { %1340 = vmatprep.subr.mxu0 %v1561_v0 }
 0x2bb   :  { %1341 = vmatpush3.msra.mxu0 %v1665_v20 }
 0x2bc   :  { %1342 = vmatprep.subr.mxu0 %v1561_v0 }
 0x2bd   :  { %1343 = vmatpush3.msra.mxu0 %v1671_v21 }
 0x2be   :  { %1344 = vmatprep.subr.mxu0 %v1561_v0 }
 0x2bf   :  { %1345 = vmatpush3.msra.mxu0 %v1677_v22 }
 0x2c0   :  { %1346 = vmatprep.subr.mxu0 %v1561_v0 }
 0x2c1   :  { %1347 = vmatpush3.msra.mxu0 %v1683_v23 }
 0x2c2   :  { %1348 = vmatprep.subr.mxu0 %v1561_v0 }
 0x2c3   :  { %1349 = vmatpush3.msra.mxu0 %v1689_v24 }
 0x2c4   :  { %1350 = vmatprep.subr.mxu0 %v1561_v0 }
 0x2c5   :  { %1351 = vmatpush3.msra.mxu0 %v1695_v25 }
 0x2c6   :  { %1390 = vmatprep.subr.mxu0 %v747_v60 }
 0x366   :  { %v493_v50 = vpop.f32.mrf.mxu0 }
 0x367   :  { %v498_v51 = vrot.slane %v493_v50, 2 }
 0x368   :  { %v1284_v52 = vpop.f32.mrf.mxu0 }
 0x369   :  { %v500_v53 = vadd.f32 %v498_v51, %v1770_v33 }
 0x36b   :  { %501 = vst [vmem:[#allocation2 + $0x2] sm:$0xc0] %v500_v53  ;;  %v503_v54 = vrot.slane %v500_v53, 6 }
 0x36d   :  { %1318 = vmatmul.mubr.f32.vlgmr.msra.gmra.mxu1 %v503_v54 }
 0x36e   :  { %1356 = vmatpush3.msra.mxu1 %v1621_v1  ;;  %1387 = vmatprep.mubr.msk.f32.mxu1 %vm1562_vm0, %v1561_v0  ;;  %v742_v1 = vld [vmem:[#allocation9 + $0x50] sm:$0xff] }
 0x36f   :  { %1357 = vmatprep.subr.mxu1 %v1561_v0 }
 0x370   :  { %1358 = vmatpush3.msra.mxu1 %v1623_v2  ;;  %v741_v2 = vld [vmem:[#allocation9 + $0x48] sm:$0xff] }
 0x371   :  { %1359 = vmatprep.subr.mxu1 %v1561_v0 }
 0x372   :  { %1360 = vmatpush3.msra.mxu1 %v1627_v3  ;;  %v740_v3 = vld [vmem:[#allocation9 + $0x40] sm:$0xff] }
 0x373   :  { %1361 = vmatprep.subr.mxu1 %v1561_v0 }
 0x374   :  { %1362 = vmatpush3.msra.mxu1 %v1631_v6 }
 0x375   :  { %1363 = vmatprep.subr.mxu1 %v1561_v0 }
 0x376   :  { %1364 = vmatpush3.msra.mxu1 %v1635_v10 }
 0x377   :  { %1365 = vmatprep.subr.mxu1 %v1561_v0 }
 0x378   :  { %1366 = vmatpush3.msra.mxu1 %v1639_v13  ;;  %v735_v13 = vld [vmem:[#allocation9 + $0x18] sm:$0xff] }
 0x379   :  { %1367 = vmatprep.subr.mxu1 %v1561_v0 }
 0x37a   :  { %1368 = vmatpush3.msra.mxu1 %v1643_v16  ;;  %v732_v16 = vld [vmem:[#allocation9] sm:$0xff] }
 0x37b   :  { %1369 = vmatprep.subr.mxu1 %v1561_v0 }
 0x37c   :  { %1370 = vmatpush3.msra.mxu1 %v1647_v17 }
 0x37d   :  { %1371 = vmatprep.subr.mxu1 %v1561_v0 }
 0x37e   :  { %1372 = vmatpush3.msra.mxu1 %v1653_v18 }
 0x37f   :  { %1373 = vmatprep.subr.mxu1 %v1561_v0 }
 0x380   :  { %1374 = vmatpush3.msra.mxu1 %v1659_v19 }
 0x381   :  { %1375 = vmatprep.subr.mxu1 %v1561_v0 }
 0x382   :  { %1376 = vmatpush3.msra.mxu1 %v1665_v20 }
 0x383   :  { %1377 = vmatprep.subr.mxu1 %v1561_v0 }
 0x384   :  { %1378 = vmatpush3.msra.mxu1 %v1671_v21 }
 0x385   :  { %1379 = vmatprep.subr.mxu1 %v1561_v0 }
 0x386   :  { %1380 = vmatpush3.msra.mxu1 %v1677_v22  ;;  %v94_v22 = vsub.s32 1, %v1758_v28 }
 0x387   :  { %1381 = vmatprep.subr.mxu1 %v1561_v0 }
 0x388   :  { %1382 = vmatpush3.msra.mxu1 %v1683_v23  ;;  %v95_v23 = vrot.slane %v1764_v30, %v94_v22 }
 0x389   :  { %1383 = vmatprep.subr.mxu1 %v1561_v0 }
 0x38a   :  { %1384 = vmatpush3.msra.mxu1 %v1689_v24  ;;  %v180_v29 = vadd.f32 %v1811_v39, %v95_v23  ;;  %v1563_v39 = vmov 1966171168  }
 0x38b   :  { %1385 = vmatprep.subr.mxu1 %v1561_v0  ;;  %v743_v0 = vld [vmem:[#allocation9 + $0x58] sm:$0xff]  ;;  %v849_v42 = vunpack.c.l.s4 %v1563_v39 }
 0x38c   :  { %1386 = vmatpush3.msra.mxu1 %v1695_v25  ;;  %v174_v25 = vadd.f32 %v1807_v37, %v95_v23 }
 0x38d   :  { %v850_v43 = vunpack.c.0.s8 %v849_v42 }
 0x38f   :  { %v853_v46 = vsub.s32 %v850_v43, %v1758_v28 }
 0x42d   :  { %v571_v56 = vpop.f32.mrf.mxu1 }
 0x42e   :  { %v575_v57 = vadd.f32 %v571_v56, %v1918_v55 }
 0x42f   :  { %v1319_v58 = vpop.f32.mrf.mxu1 }
 0x430   :  { %576 = vst [vmem:[#allocation2 + $0xa] sm:$0x3] %v575_v57  ;;  %1353 = vmatmul.mubr.f32.vlgmr.msra.gmra.mxu0 %v575_v57 }
 0x431   :  { %1422 = vmatprep.mubr.f32.mxu0 %v730_v59  ;;  %1391 = vmatpush3.msra.mxu0 %v747_v60 }
 0x432   :  { %1392 = vmatprep.subr.mxu0 %v746_v61 }
 0x433   :  { %1393 = vmatpush3.msra.mxu0 %v746_v61 }
 0x434   :  { %1394 = vmatprep.subr.mxu0 %v745_v62 }
 0x435   :  { %1395 = vmatpush3.msra.mxu0 %v745_v62 }
 0x436   :  { %1396 = vmatprep.subr.mxu0 %v744_v63 }
 0x437   :  { %1397 = vmatpush3.msra.mxu0 %v744_v63 }
 0x438   :  { %1398 = vmatprep.subr.mxu0 %v743_v0 }
 0x439   :  { %1399 = vmatpush3.msra.mxu0 %v743_v0 }
 0x43a   :  { %1400 = vmatprep.subr.mxu0 %v742_v1 }
 0x43b   :  { %1401 = vmatpush3.msra.mxu0 %v742_v1 }
 0x43c   :  { %1402 = vmatprep.subr.mxu0 %v741_v2 }
 0x43d   :  { %1403 = vmatpush3.msra.mxu0 %v741_v2 }
 0x43e   :  { %1404 = vmatprep.subr.mxu0 %v740_v3 }
 0x43f   :  { %1405 = vmatpush3.msra.mxu0 %v740_v3 }
 0x440   :  { %1406 = vmatprep.subr.mxu0 %v739_v4 }
 0x441   :  { %1407 = vmatpush3.msra.mxu0 %v739_v4 }
 0x442   :  { %1408 = vmatprep.subr.mxu0 %v738_v5 }
 0x443   :  { %1409 = vmatpush3.msra.mxu0 %v738_v5 }
 0x444   :  { %1410 = vmatprep.subr.mxu0 %v737_v11 }
 0x445   :  { %1411 = vmatpush3.msra.mxu0 %v737_v11 }
 0x446   :  { %1412 = vmatprep.subr.mxu0 %v736_v12 }
 0x447   :  { %1413 = vmatpush3.msra.mxu0 %v736_v12 }
 0x448   :  { %1414 = vmatprep.subr.mxu0 %v735_v13 }
 0x449   :  { %1415 = vmatpush3.msra.mxu0 %v735_v13 }
 0x44a   :  { %1416 = vmatprep.subr.mxu0 %v734_v14 }
 0x44b   :  { %1417 = vmatpush3.msra.mxu0 %v734_v14 }
 0x44c   :  { %1418 = vmatprep.subr.mxu0 %v733_v15 }
 0x44d   :  { %1419 = vmatpush3.msra.mxu0 %v733_v15 }
 0x44e   :  { %1420 = vmatprep.subr.mxu0 %v732_v16 }
 0x44f   :  { %1421 = vmatpush3.msra.mxu0 %v732_v16 }
 0x4f0   :  { %v643_v6 = vpop.f32.mrf.mxu0 }
 0x4f1   :  { %v648_v7 = vrot.slane %v643_v6, 6 }
 0x4f2   :  { %v1354_v8 = vpop.f32.mrf.mxu0 }
 0x4f3   :  { %v650_v9 = vadd.f32 %v648_v7, %v1918_v55 }
 0x4f5   :  { %651 = vst [vmem:[#allocation2 + $0xa] sm:$0xc] %v650_v9  ;;  %v653_v10 = vrot.slane %v650_v9, 2 }
 0x4f7   :  { %1388 = vmatmul.mubr.f32.vlgmr.msra.gmra.mxu1 %v653_v10 }
 0x5b7   :  { %v721_v17 = vpop.f32.mrf.mxu1 }
 0x5b8   :  { %v726_v18 = vrot.slane %v721_v17, 4 }
 0x5b9   :  { %v1389_v19 = vpop.f32.mrf.mxu1 }
 0x5ba   :  { %v728_v20 = vadd.f32 %v726_v18, %v1918_v55 }
 0x5bc   :  { %729 = vst [vmem:[#allocation2 + $0xa] sm:$0x30] %v728_v20 }
 0x5c3   :  { %v731_v21 = vld [vmem:[#allocation2 + $0x8] sm:$0xff] }
 0x5c4   :  { %1423 = vmatmul.mubr.f32.vlgmr.msra.gmra.mxu0 %v731_v21 }
 0x684   :  { %v1424_v24 = vpop.f32.mrf.mxu0 }
 0x685   :  { %v824_v31 = vadd.f32 %v1424_v24, %v180_v29 }
 0x686   :  { %v814_v26 = vpop.f32.mrf.mxu0 }
 0x687   :  { %v823_v27 = vadd.f32 %v814_v26, %v174_v25 }
 0x689   :  { %825 = vmax.xlane.f32.xlu0 %v823_v27 }
 0x68d   :  { %827 = vmax.xlane.f32.xlu0 %v824_v31 }
 0x712   :  { %v826_v32 = vpop.xlane.xlu0 %825 }
 0x713   :  { %v829_v33 = vsub.f32 %v823_v27, %v826_v32 }
 0x715   :  { %v831_v34 = vmul.f32 1.442695, %v829_v33 }
 0x716   :  { %v828_v35 = vpop.xlane.xlu0 %827 }
 0x717   :  { %1437 = vpow2.f32 %v831_v34  ;;  %v830_v36 = vsub.f32 %v824_v31, %v828_v35 }
 0x719   :  { %v833_v38 = vmul.f32 1.442695, %v830_v36 }
 0x71b   :  { %1439 = vpow2.f32 %v833_v38 }
 0x724   :  { %v1438_v40 = vpop.eup %1437 }
 0x725   :  { %835 = vadd.xlane.f32.xlu1 %v1438_v40 }
 0x728   :  { %v1440_v30 = vpop.eup %1439 }
 0x729   :  { %837 = vadd.xlane.f32.xlu1 %v1440_v30 }
 0x7ae   :  { %v836_v37 = vpop.xlane.xlu1 %835 }
 0x7af   :  { %1441 = vlog2.f32 %v836_v37 }
 0x7b2   :  { %v838_v41 = vpop.xlane.xlu1 %837 }
 0x7b3   :  { %1443 = vlog2.f32 %v838_v41 }
 0x7bc   :  { %v1442_v44 = vpop.eup %1441 }
 0x7bd   :  { %v840_v45 = vmul.f32 0.6931472, %v1442_v44 }
 0x7bf   :  { %v843_v47 = vadd.f32 %v840_v45, %v826_v32 }
 0x7c0   :  { %v1444_v48 = vpop.eup %1443 }
 0x7c1   :  { %v845_v49 = vsub.f32 %v823_v27, %v843_v47  ;;  %v842_v50 = vmul.f32 0.6931472, %v1444_v48 }
 0x7c3   :  { %v854_v51 = vrot.slane %v845_v49, %v853_v46  ;;  %v880_v52 = vcombine.high %v845_v49, %v845_v49  ;;  %v844_v53 = vadd.f32 %v842_v50, %v828_v35 }
 0x7c5   :  { %v855_v54 = vcombine.high %v854_v51, %v854_v51  ;;  %v862_v55 = vrot.slane %v854_v51, %v853_v46  ;;  %1000 = vst.sshfl [vmem:[#allocation11] sm:$0x1 pattern:$0x73625140] %v854_v51  ;;  %v887_v56 = vrot.slane %v880_v52, %v853_v46  ;;  %v846_v57 = vsub.f32 %v824_v31, %v844_v53 }
 0x7c7   :  { %v869_v58 = vrot.slane %v855_v54, %v853_v46  ;;  %1001 = vst.sshfl [vmem:[#allocation11 + $0x8] sm:$0x1 pattern:$0x73625140] %v855_v54  ;;  %v874_v59 = vcombine.high %v862_v55, %v862_v55  ;;  %v888_v60 = vcombine.high %v887_v56, %v887_v56  ;;  %v895_v61 = vrot.slane %v887_v56, %v853_v46 }
 0x7c8   :  { %1002 = vst.sshfl [vmem:[#allocation11 + $0x2] sm:$0x1 pattern:$0x73625140] %v887_v56  ;;  %v920_v62 = vrot.slane %v846_v57, %v853_v46  ;;  %v946_v28 = vcombine.high %v846_v57, %v846_v57 }
 0x7c9   :  { %v875_v63 = vcombine.high %v869_v58, %v869_v58  ;;  %878 = vst [vmem:[#allocation11 + $0x1] sm:$0x1] %v874_v59  ;;  %v902_v0 = vrot.slane %v888_v60, %v853_v46  ;;  %1003 = vst.sshfl [vmem:[#allocation11 + $0xa] sm:$0x1 pattern:$0x73625140] %v888_v60  ;;  %v907_v1 = vcombine.high %v895_v61, %v895_v61 }
 0x7ca   :  { %v921_v2 = vcombine.high %v920_v62, %v920_v62  ;;  %v928_v3 = vrot.slane %v920_v62, %v853_v46  ;;  %1004 = vst.sshfl [vmem:[#allocation11 + $0x4] sm:$0x1 pattern:$0x73625140] %v920_v62  ;;  %v953_v4 = vrot.slane %v946_v28, %v853_v46 }
 0x7cb   :  { %879 = vst [vmem:[#allocation11 + $0x9] sm:$0x1] %v875_v63  ;;  %v908_v5 = vcombine.high %v902_v0, %v902_v0  ;;  %911 = vst [vmem:[#allocation11 + $0x3] sm:$0x1] %v907_v1 }
 0x7cc   :  { %v935_v6 = vrot.slane %v921_v2, %v853_v46  ;;  %1005 = vst.sshfl [vmem:[#allocation11 + $0xc] sm:$0x1 pattern:$0x73625140] %v921_v2  ;;  %v940_v7 = vcombine.high %v928_v3, %v928_v3  ;;  %v954_v8 = vcombine.high %v953_v4, %v953_v4  ;;  %v961_v9 = vrot.slane %v953_v4, %v853_v46 }
 0x7cd   :  { %1006 = vst.sshfl [vmem:[#allocation11 + $0x6] sm:$0x1 pattern:$0x73625140] %v953_v4  ;;  %912 = vst [vmem:[#allocation11 + $0xb] sm:$0x1] %v908_v5 }
 0x7ce   :  { %v941_v10 = vcombine.high %v935_v6, %v935_v6  ;;  %944 = vst [vmem:[#allocation11 + $0x5] sm:$0x1] %v940_v7  ;;  %v968_v11 = vrot.slane %v954_v8, %v853_v46  ;;  %1007 = vst.sshfl [vmem:[#allocation11 + $0xe] sm:$0x1 pattern:$0x73625140] %v954_v8  ;;  %v973_v12 = vcombine.high %v961_v9, %v961_v9 }
 0x7d0   :  { %945 = vst [vmem:[#allocation11 + $0xd] sm:$0x1] %v941_v10  ;;  %v974_v13 = vcombine.high %v968_v11, %v968_v11  ;;  %977 = vst [vmem:[#allocation11 + $0x7] sm:$0x1] %v973_v12 }
 0x7d2   :  { %978 = vst [vmem:[#allocation11 + $0xf] sm:$0x1] %v974_v13 }
 0x7d3   :  { %1536 = shalt.err (!%p1533_p10)
}
 0x7d4   :  { %990 = dma.vmem_to_hbm [thread:$0]  %s985_s15, 256, %s1939_s5, [#allocation5], %s1557_s28, %s1557_s28, %s1558_s29  }
 0x7d5   :  { %1551 = dma.done.wait [#allocation5], 256  }
 0x7d6   :  { %1552 = vsyncadd [#allocation5], 4294967040 }
 0x7d7   :  { %994 = vsyncpa [#allocation4], 1 }
 0x7d8   :  { %995 = vsyncpa [#allocation7], 1 }
 0x7d9   :  { %996 = vsyncpa [#allocation10], 1 }
 0x7da   :  { %997 = vsyncpa [#allocation5], 1 }

</bundles_post_ra>
